<compile_context>
chip_gen: v7x
topology: tpu7x:2x2x1
jax: 0.10.0
libtpu: 0.0.40
codegen_flags: <defaults>
</compile_context>

<pallas_src>
import math

import jax
import jax.numpy as jnp
from jax import lax
from jax.experimental import pallas as pl
from jax.experimental.pallas import tpu as pltpu

MIN_FP16 = -65504.0   # torch.finfo(torch.float16).min
LN_EPS = 1e-12
BF16 = jnp.bfloat16


def _layernorm(h, w, b):
    # NOTE: matches the PyTorch module exactly: (x - mean) / (var + eps)  (no sqrt!)
    mean = jnp.mean(h, axis=-1, keepdims=True)
    var = jnp.mean((h - mean) ** 2, axis=-1, keepdims=True)
    return w * (h - mean) / (var + LN_EPS) + b


def _gelu_exact(x):
    return 0.5 * x * (1.0 + lax.erf(x / math.sqrt(2.0)))


# --------------------------- pass 1: LN1 + fused QKV projection ---------------------------
def qkv_kernel(x_ref, ln1w_ref, ln1b_ref, wqkv_ref, bqkv_ref, q_ref, kv_ref):
    x = x_ref[0]                                        # (TT, D) f32
    D = x.shape[-1]
    h = _layernorm(x, ln1w_ref[...], ln1b_ref[...])
    # bf16 MXU operands, f32 accumulation; wqkv columns are pre-permuted in the wrapper
    # to lane-dense [Q heads | K heads | V heads] slabs (col = head*hs + feature).
    qkv = jnp.dot(h.astype(BF16), wqkv_ref[...],
                  preferred_element_type=jnp.float32) + bqkv_ref[...]       # (TT, 3D) f32
    q_ref[0] = qkv[:, :D].astype(q_ref.dtype)           # bf16 (internal only)
    kv_ref[0, 0] = qkv[:, D:2 * D].astype(kv_ref.dtype)  # k slab, f32 (returned)
    kv_ref[1, 0] = qkv[:, 2 * D:].astype(kv_ref.dtype)   # v slab, f32 (returned)


# -------------- pass 2: flash attention + head-merge out-proj + residual 1 --------------
def attn_kernel(x_ref, q_ref, k_ref, v_ref, wattn_ref, battn_ref, x1_ref,
                m_sc, l_sc, acc_sc):
    qi = pl.program_id(1)
    ki = pl.program_id(2)

    H, TQ, hs = q_ref.shape[1], q_ref.shape[2], q_ref.shape[3]
    TK = k_ref.shape[3]
    inv_scale = 1.0 / math.sqrt(hs)
    # Last kv tile containing any unmasked column for this q tile.
    last_k = ((qi + 1) * TQ - 1) // TK

    @pl.when(ki == 0)
    def _init():
        m_sc[...] = jnp.full(m_sc.shape, -jnp.inf, m_sc.dtype)
        l_sc[...] = jnp.zeros(l_sc.shape, l_sc.dtype)
        acc_sc[...] = jnp.zeros(acc_sc.shape, acc_sc.dtype)

    def _flash_update(apply_mask):
        q = q_ref[0]                                    # (H, TQ, hs) bf16
        k = k_ref[0, 0].astype(BF16)                    # (H, TK, hs)
        v = v_ref[0, 0].astype(BF16)                    # (H, TK, hs)
        # scores: contract head_size, batch over heads (no explicit transpose of k).
        s = lax.dot_general(q, k, (((2,), (2,)), ((0,), (0,))),
                            preferred_element_type=jnp.float32) * inv_scale  # (H,TQ,TK) f32
        if apply_mask:
            # 2-D iota mask, broadcast over heads (only on diagonal-straddling tiles).
            row = qi * TQ + lax.broadcasted_iota(jnp.int32, (TQ, TK), 0)
            col = ki * TK + lax.broadcasted_iota(jnp.int32, (TQ, TK), 1)
            s = jnp.where((col <= row)[None, :, :], s, MIN_FP16)  # masked_fill(min_fp16)
        m_prev = m_sc[...]                              # (H, TQ, 1)
        m_new = jnp.maximum(m_prev, jnp.max(s, axis=-1, keepdims=True))
        alpha = jnp.exp(m_prev - m_new)
        p = jnp.exp(s - m_new)                          # (H, TQ, TK) f32
        l_sc[...] = alpha * l_sc[...] + jnp.sum(p, axis=-1, keepdims=True)
        acc_sc[...] = alpha * acc_sc[...] + lax.dot_general(
            p.astype(BF16), v, (((2,), (1,)), ((0,), (0,))),
            preferred_element_type=jnp.float32)         # (H, TQ, hs) f32
        m_sc[...] = m_new

    # Tiles fully below the causal diagonal: no mask math needed.
    @pl.when((ki + 1) * TK - 1 <= qi * TQ)
    def _update_unmasked():
        _flash_update(apply_mask=False)

    # Diagonal-straddling tiles: apply the causal mask.
    @pl.when(((ki + 1) * TK - 1 > qi * TQ) & (ki <= last_k))
    def _update_masked():
        _flash_update(apply_mask=True)

    # Fully-masked tiles (ki > last_k): no compute, and the clamped k/v index_map means
    # no DMA either.

    @pl.when(ki == last_k)
    def _finalize():
        attn = acc_sc[...] * pl.reciprocal(l_sc[...], approx=False)      # (H, TQ, hs) f32
        # TODO(synk): a single dot_general contracting both (H, hs) against wattn (H,hs,D)
        # would use full MXU depth, but multi-contracting-dim dot_general is not reliably
        # lowered by Mosaic; keep head-batched matmul + cheap sum over heads (runs once
        # per q tile, off the hot kv loop).
        per_head = lax.dot_general(attn.astype(BF16), wattn_ref[...],
                                   (((2,), (1,)), ((0,), (0,))),
                                   preferred_element_type=jnp.float32)   # (H, TQ, D)
        ff_o = jnp.sum(per_head, axis=0) + battn_ref[...]                # (TQ, D)
        x1_ref[0] = (x_ref[0] + ff_o).astype(x1_ref.dtype)               # residual 1


# -------------------- pass 3: LN2 + MLP (d_ff tiled) + residual 2 --------------------
def mlp_kernel(x1_ref, ln2w_ref, ln2b_ref, w1_ref, b1_ref, w2_ref, b2_ref,
               y_ref, acc_ref, h2_ref):
    f = pl.program_id(2)

    @pl.when(f == 0)
    def _init():
        acc_ref[...] = jnp.zeros_like(acc_ref)
        # LN2(x1) computed once per (b, t) tile, cached in bf16 scratch for all ff tiles.
        h2_ref[...] = _layernorm(x1_ref[0], ln2w_ref[...], ln2b_ref[...]).astype(h2_ref.dtype)

    m1 = _gelu_exact(jnp.dot(h2_ref[...], w1_ref[...],
                             preferred_element_type=jnp.float32) + b1_ref[...])  # (TT, TF)
    acc_ref[...] += jnp.dot(m1.astype(BF16), w2_ref[...],
                            preferred_element_type=jnp.float32)                  # (TT, D)

    @pl.when(f == pl.num_programs(2) - 1)
    def _finalize():
        y_ref[0] = (x1_ref[0] + acc_ref[...] + b2_ref[...]).astype(y_ref.dtype)  # residual 2


# ------------------------------------- helpers -------------------------------------
def _pick(n, prefer):
    for t in prefer:
        if n % t == 0 and n >= t:
            return t
    return n  # tiny / odd sizes: single tile (still correct)


def _vmem_limit_bytes():
    # ~3/4 of physical VMEM: ~96 MiB on v5e/v6e (128 MiB), ~48 MiB on v7x (64 MiB).
    try:
        cap = int(pltpu.get_tpu_info().vmem_capacity_bytes)
        if cap < 32 * 1024 * 1024:
            cap = 64 * 1024 * 1024
    except Exception:
        cap = 64 * 1024 * 1024   # conservative fallback (safe on every generation)
    return int(cap * 3 // 4)


# ------------------------------------- wrapper -------------------------------------
def block_forward(x, params, num_head, *, tile_t=None, tile_q=None, tile_k=None, tile_f=None):
    (ln1w, ln1b, wqkv, bqkv, wattn, battn, ln2w, ln2b, w1, b1, w2, b2) = params
    B, T, D = x.shape
    H = num_head
    assert D % H == 0
    hs = D // H
    d_ff = w1.shape[-1]

    # ---- weight re-layout + bf16 cast for MXU operands (plain JAX, layout plumbing) ----
    # Original fused-QKV column for (head h, part p in {q,k,v}, feature j) is h*3*hs+p*hs+j.
    # Permute to [all Q | all K | all V], each D wide with column = h*hs + j (lane-dense).
    heads = jnp.arange(H, dtype=jnp.int32)[:, None] * (3 * hs)
    feats = jnp.arange(hs, dtype=jnp.int32)[None, :]
    qcols = (heads + feats).reshape(-1)
    perm = jnp.concatenate([qcols, qcols + hs, qcols + 2 * hs])
    wqkv_p = wqkv[:, perm].astype(BF16)
    bqkv_p = bqkv[:, perm]                           # biases stay f32 (post-accumulation add)
    wattn_r = wattn.reshape(H, hs, D).astype(BF16)   # row h*hs+j -> wattn_r[h, j, :]
    w1_bf = w1.astype(BF16)
    w2_bf = w2.astype(BF16)

    # ---- generation-aware tile sizes (demo shapes collapse to a single tile) ----
    tt = tile_t or _pick(T, (512, 256, 128))
    tq = tile_q or _pick(T, (512, 256, 128))
    tk = tile_k or _pick(T, (256, 128))
    # Keep the f32 (H, tq, tk) score/prob intermediates to ~8 MiB so they never spill.
    while tile_q is None and H * tq * tk * 4 > 8 * 1024 * 1024 and tq > 128 and tq % 2 == 0:
        tq //= 2
    tf = tile_f or _pick(d_ff, (1024, 512, 256, 128))

    vmem_limit = _vmem_limit_bytes()
    const2 = lambda *_: (0, 0)

    # ---- pass 1: LN1 + QKV projection; q (bf16, internal) + stacked k/v slab ----
    # TODO(synk): pipeline_mode=pl.Buffered(1) on the constant-index wqkv/bias specs would
    # halve their VMEM (they are fetched once); left off pending Mosaic support guarantees.
    q3, kv3 = pl.pallas_call(
        qkv_kernel,
        out_shape=(jax.ShapeDtypeStruct((B, T, D), BF16),
                   jax.ShapeDtypeStruct((2, B, T, D), x.dtype)),
        grid=(B, T // tt),
        in_specs=[
            pl.BlockSpec((1, tt, D), lambda b, t: (b, t, 0)),   # x
            pl.BlockSpec((1, D), const2),                       # ln1 w
            pl.BlockSpec((1, D), const2),                       # ln1 b
            pl.BlockSpec((D, 3 * D), const2),                   # qkv W (permuted, bf16)
            pl.BlockSpec((1, 3 * D), const2),                   # qkv b (permuted, f32)
        ],
        out_specs=(pl.BlockSpec((1, tt, D), lambda b, t: (b, t, 0)),
                   pl.BlockSpec((2, 1, tt, D), lambda b, t: (0, b, t, 0))),
        compiler_params=pltpu.CompilerParams(
            dimension_semantics=("parallel", "parallel"),
            vmem_limit_bytes=vmem_limit),
    )(x, ln1w, ln1b, wqkv_p, bqkv_p)

    # ---- single layout pass each for q and stacked kv (no per-tensor transpose + stack) ----
    qh = q3.reshape(B, T, H, hs).transpose(0, 2, 1, 3)            # (B, H, T, hs) bf16
    kv = kv3.reshape(2, B, T, H, hs).transpose(0, 1, 3, 2, 4)     # (2, B, H, T, hs) f32
    next_prefix_kv = kv                                            # torch.stack((k, v))

    # ---- pass 2: flash attention + out-proj + residual 1 ----
    def k_map(b, qi, ki):
        last = ((qi + 1) * tq - 1) // tk
        return (0, b, 0, jnp.minimum(ki, last), 0)   # clamp: masked tiles re-use prev block

    def v_map(b, qi, ki):
        last = ((qi + 1) * tq - 1) // tk
        return (1, b, 0, jnp.minimum(ki, last), 0)

    # TODO(synk): pipeline_mode=pl.Buffered(3) on the k/v specs (v7x headroom) and packing
    # the m/l scratch into one lane-padded buffer are further VMEM/latency tweaks.
    x1 = pl.pallas_call(
        attn_kernel,
        out_shape=jax.ShapeDtypeStruct((B, T, D), x.dtype),
        grid=(B, T // tq, T // tk),
        in_specs=[
            pl.BlockSpec((1, tq, D), lambda b, qi, ki: (b, qi, 0)),          # x (residual)
            pl.BlockSpec((1, H, tq, hs), lambda b, qi, ki: (b, 0, qi, 0)),   # q (bf16)
            pl.BlockSpec((1, 1, H, tk, hs), k_map),                          # k (kv slot 0)
            pl.BlockSpec((1, 1, H, tk, hs), v_map),                          # v (kv slot 1)
            pl.BlockSpec((H, hs, D), lambda b, qi, ki: (0, 0, 0)),           # wattn (bf16)
            pl.BlockSpec((1, D), lambda b, qi, ki: (0, 0)),                  # battn
        ],
        out_specs=pl.BlockSpec((1, tq, D), lambda b, qi, ki: (b, qi, 0)),
        scratch_shapes=[
            pltpu.VMEM((H, tq, 1), jnp.float32),    # running max
            pltpu.VMEM((H, tq, 1), jnp.float32),    # running denom
            pltpu.VMEM((H, tq, hs), jnp.float32),   # running numerator
        ],
        compiler_params=pltpu.CompilerParams(
            dimension_semantics=("parallel", "parallel", "arbitrary"),
            vmem_limit_bytes=vmem_limit),
    )(x, qh, kv, kv, wattn_r, battn)

    # ---- pass 3: LN2 + MLP (d_ff tiled on its own grid axis) + residual 2 ----
    y = pl.pallas_call(
        mlp_kernel,
        out_shape=jax.ShapeDtypeStruct((B, T, D), x.dtype),
        grid=(B, T // tt, d_ff // tf),
        in_specs=[
            pl.BlockSpec((1, tt, D), lambda b, t, f: (b, t, 0)),   # x1
            pl.BlockSpec((1, D), lambda b, t, f: (0, 0)),          # ln2 w
            pl.BlockSpec((1, D), lambda b, t, f: (0, 0)),          # ln2 b
            pl.BlockSpec((D, tf), lambda b, t, f: (0, f)),         # ff1 W (bf16)
            pl.BlockSpec((1, tf), lambda b, t, f: (0, f)),         # ff1 b
            pl.BlockSpec((tf, D), lambda b, t, f: (f, 0)),         # ff2 W (bf16)
            pl.BlockSpec((1, D), lambda b, t, f: (0, 0)),          # ff2 b
        ],
        out_specs=pl.BlockSpec((1, tt, D), lambda b, t, f: (b, t, 0)),
        scratch_shapes=[
            pltpu.VMEM((tt, D), jnp.float32),   # ff2 partial-sum accumulator
            pltpu.VMEM((tt, D), BF16),          # cached LN2(x1)
        ],
        compiler_params=pltpu.CompilerParams(
            dimension_semantics=("parallel", "parallel", "arbitrary"),
            vmem_limit_bytes=vmem_limit),
    )(x1, ln2w, ln2b, w1_bf, b1, w2_bf, b2)

    return y, next_prefix_kv


# ------------------------- pure-JAX reference (for verification) -------------------------
def block_ref(x, params, num_head):
    (ln1w, ln1b, wqkv, bqkv, wattn, battn, ln2w, ln2b, w1, b1, w2, b2) = params
    B, T, D = x.shape
    hs = D // num_head

    def ln(h, w, b):
        m = h.mean(-1, keepdims=True)
        v = ((h - m) ** 2).mean(-1, keepdims=True)
        return w * (h - m) / (v + LN_EPS) + b

    h = ln(x, ln1w, ln1b)
    qkv = h @ wqkv + bqkv                                            # (B, T, 3D)
    qkv = qkv.reshape(B, T, num_head, 3 * hs).transpose(0, 2, 1, 3)  # (B, H, T, 3hs)
    q, k, v = qkv[..., :hs], qkv[..., hs:2 * hs], qkv[..., 2 * hs:]
    scores = (q @ jnp.swapaxes(k, -1, -2)) / math.sqrt(hs)
    mask = jnp.tril(jnp.ones((T, T)))
    scores = jnp.where(mask == 0, MIN_FP16, scores)
    p = jax.nn.softmax(scores, axis=-1)
    o = (p @ v).transpose(0, 2, 1, 3).reshape(B, T, D)
    x1 = x + (o @ wattn + battn)
    h2 = ln(x1, ln2w, ln2b)
    m1 = jax.nn.gelu(h2 @ w1 + b1, approximate=False)
    y = x1 + (m1 @ w2 + b2)
    return y, jnp.stack([k, v], axis=0)


# ------------------------------------- main -------------------------------------
if __name__ == "__main__":
    B, T, D, H = 2, 16, 32, 4        # batch, seq, d_model, num_head
    d_ff = 4 * D

    key = jax.random.PRNGKey(0)
    keys = jax.random.split(key, 9)
    s = 0.02

    params = (
        jnp.ones((1, D), jnp.float32),                                # ln1 w
        jnp.zeros((1, D), jnp.float32),                               # ln1 b
        s * jax.random.normal(keys[0], (D, 3 * D), jnp.float32),      # qkv W
        s * jax.random.normal(keys[1], (1, 3 * D), jnp.float32),      # qkv b
        s * jax.random.normal(keys[2], (D, D), jnp.float32),          # attn out W
        s * jax.random.normal(keys[3], (1, D), jnp.float32),          # attn out b
        jnp.ones((1, D), jnp.float32),                                # ln2 w
        jnp.zeros((1, D), jnp.float32),                               # ln2 b
        s * jax.random.normal(keys[4], (D, d_ff), jnp.float32),       # ff1 W
        s * jax.random.normal(keys[5], (1, d_ff), jnp.float32),       # ff1 b
        s * jax.random.normal(keys[6], (d_ff, D), jnp.float32),       # ff2 W
        s * jax.random.normal(keys[7], (1, D), jnp.float32),          # ff2 b
    )

    x = jax.random.normal(keys[8], (B, T, D), jnp.float32)

    # Small forced tiles so the multi-tile flash path, causal kv clamping and the
    # init/finalize accumulator logic are all exercised at toy sizes.
    y, kv = block_forward(x, params, num_head=H, tile_t=8, tile_q=8, tile_k=8)
    jax.block_until_ready((y, kv))

    y_ref, kv_ref = block_ref(x, params, num_head=H)
    assert y.shape == (B, T, D) and kv.shape == (2, B, H, T, D // H)
    # bf16 MXU operands (perf review item 1) -> tolerance relaxed vs the pure-f32 reference.
    assert jnp.allclose(y, y_ref, rtol=1e-2, atol=1e-2), "output mismatch vs reference"
    assert jnp.allclose(kv, kv_ref, rtol=1e-2, atol=1e-2), "kv mismatch vs reference"

    print("KERNEL_OK")
</pallas_src>

<mosaic_0001>
module attributes {stable_mosaic.version = 11 : i64} {
  func.func @qkv_kernel(%arg0: i32, %arg1: i32, %arg2: memref<1x8x32xf32, #tpu.memory_space<vmem>>, %arg3: memref<1x32xf32, #tpu.memory_space<vmem>>, %arg4: memref<1x32xf32, #tpu.memory_space<vmem>>, %arg5: memref<32x96xbf16, #tpu.memory_space<vmem>>, %arg6: memref<1x96xf32, #tpu.memory_space<vmem>>, %arg7: memref<1x8x32xbf16, #tpu.memory_space<vmem>>, %arg8: memref<2x1x8x32xf32, #tpu.memory_space<vmem>>) attributes {dimension_semantics = [#tpu.dimension_semantics<parallel>, #tpu.dimension_semantics<parallel>], iteration_bounds = array<i64: 2, 2>, scalar_prefetch = 0 : i64, scratch_operands = 0 : i64, tpu.core_type = #tpu.core_type<tc>, window_params = [{transform_indices = @transform_0, window_bounds = array<i64: 1, 8, 32>}, {pipeline_mode = #tpu.pipeline_mode<synchronous>, transform_indices = @transform_1, window_bounds = array<i64: 1, 32>}, {pipeline_mode = #tpu.pipeline_mode<synchronous>, transform_indices = @transform_2, window_bounds = array<i64: 1, 32>}, {pipeline_mode = #tpu.pipeline_mode<synchronous>, transform_indices = @transform_3, window_bounds = array<i64: 32, 96>}, {pipeline_mode = #tpu.pipeline_mode<synchronous>, transform_indices = @transform_4, window_bounds = array<i64: 1, 96>}, {transform_indices = @transform_5, window_bounds = array<i64: 1, 8, 32>}, {transform_indices = @transform_6, window_bounds = array<i64: 2, 1, 8, 32>}]} {
    %c0 = arith.constant 0 : index
    %c0_0 = arith.constant 0 : index
    %c0_1 = arith.constant 0 : index
    %0 = vector.load %arg2[%c0, %c0_0, %c0_1] : memref<1x8x32xf32, #tpu.memory_space<vmem>>, vector<1x8x32xf32>
    %1 = vector.shape_cast %0 : vector<1x8x32xf32> to vector<8x32xf32>
    %c0_2 = arith.constant 0 : index
    %c0_3 = arith.constant 0 : index
    %2 = vector.load %arg3[%c0_2, %c0_3] : memref<1x32xf32, #tpu.memory_space<vmem>>, vector<1x32xf32>
    %c0_4 = arith.constant 0 : index
    %c0_5 = arith.constant 0 : index
    %3 = vector.load %arg4[%c0_4, %c0_5] : memref<1x32xf32, #tpu.memory_space<vmem>>, vector<1x32xf32>
    %cst = arith.constant dense<0.000000e+00> : vector<8xf32>
    %4 = vector.multi_reduction <add>, %1, %cst [1] : vector<8x32xf32> to vector<8xf32>
    %5 = vector.shape_cast %4 : vector<8xf32> to vector<8x1xf32>
    %cst_6 = arith.constant 3.200000e+01 : f32
    %6 = vector.broadcast %cst_6 : f32 to vector<8x1xf32>
    %7 = arith.divf %5, %6 : vector<8x1xf32>
    %8 = vector.broadcast %7 : vector<8x1xf32> to vector<8x32xf32>
    %9 = arith.subf %1, %8 : vector<8x32xf32>
    %10 = arith.mulf %9, %9 : vector<8x32xf32>
    %cst_7 = arith.constant dense<0.000000e+00> : vector<8xf32>
    %11 = vector.multi_reduction <add>, %10, %cst_7 [1] : vector<8x32xf32> to vector<8xf32>
    %12 = vector.shape_cast %11 : vector<8xf32> to vector<8x1xf32>
    %cst_8 = arith.constant 3.200000e+01 : f32
    %13 = vector.broadcast %cst_8 : f32 to vector<8x1xf32>
    %14 = arith.divf %12, %13 : vector<8x1xf32>
    %15 = vector.broadcast %7 : vector<8x1xf32> to vector<8x32xf32>
    %16 = arith.subf %1, %15 : vector<8x32xf32>
    %17 = vector.broadcast %2 : vector<1x32xf32> to vector<8x32xf32>
    %18 = arith.mulf %17, %16 : vector<8x32xf32>
    %cst_9 = arith.constant 9.99999996E-13 : f32
    %19 = vector.broadcast %cst_9 : f32 to vector<8x1xf32>
    %20 = arith.addf %14, %19 : vector<8x1xf32>
    %21 = vector.broadcast %20 : vector<8x1xf32> to vector<8x32xf32>
    %22 = arith.divf %18, %21 : vector<8x32xf32>
    %23 = vector.broadcast %3 : vector<1x32xf32> to vector<8x32xf32>
    %24 = arith.addf %22, %23 : vector<8x32xf32>
    %25 = arith.truncf %24 : vector<8x32xf32> to vector<8x32xbf16>
    %c0_10 = arith.constant 0 : index
    %c0_11 = arith.constant 0 : index
    %26 = vector.load %arg5[%c0_10, %c0_11] : memref<32x96xbf16, #tpu.memory_space<vmem>>, vector<32x96xbf16>
    %cst_12 = arith.constant dense<0.000000e+00> : vector<8x96xf32>
    %27 = tpu.matmul %25, %26, %cst_12 {dimension_numbers = #tpu.dot_dimension_numbers<[1], [0], [0], [1], [0, 0, 1, 1], [], []>} : vector<8x32xbf16>, vector<32x96xbf16>, vector<8x96xf32> -> vector<8x96xf32>
    %c0_13 = arith.constant 0 : index
    %c0_14 = arith.constant 0 : index
    %28 = vector.load %arg6[%c0_13, %c0_14] : memref<1x96xf32, #tpu.memory_space<vmem>>, vector<1x96xf32>
    %29 = vector.broadcast %28 : vector<1x96xf32> to vector<8x96xf32>
    %30 = arith.addf %27, %29 : vector<8x96xf32>
    %31 = vector.extract_strided_slice %30 {offsets = [0, 0], sizes = [8, 32], strides = [1, 1]} : vector<8x96xf32> to vector<8x32xf32>
    %32 = arith.truncf %31 : vector<8x32xf32> to vector<8x32xbf16>
    %c0_15 = arith.constant 0 : index
    %c0_16 = arith.constant 0 : index
    %c0_17 = arith.constant 0 : index
    %33 = vector.load %arg7[%c0_15, %c0_16, %c0_17] : memref<1x8x32xbf16, #tpu.memory_space<vmem>>, vector<1x8x32xbf16>
    %34 = vector.shape_cast %33 : vector<1x8x32xbf16> to vector<8x32xbf16>
    %35 = vector.shape_cast %32 : vector<8x32xbf16> to vector<1x8x32xbf16>
    tpu.vector_store %arg7[%c0_15, %c0_16, %c0_17], %35 {strides = array<i32>} : memref<1x8x32xbf16, #tpu.memory_space<vmem>>, vector<1x8x32xbf16>,
    %36 = vector.extract_strided_slice %30 {offsets = [0, 32], sizes = [8, 32], strides = [1, 1]} : vector<8x96xf32> to vector<8x32xf32>
    %c0_18 = arith.constant 0 : index
    %c0_19 = arith.constant 0 : index
    %c0_20 = arith.constant 0 : index
    %c0_21 = arith.constant 0 : index
    %37 = vector.load %arg8[%c0_18, %c0_19, %c0_20, %c0_21] : memref<2x1x8x32xf32, #tpu.memory_space<vmem>>, vector<1x1x8x32xf32>
    %38 = vector.shape_cast %37 : vector<1x1x8x32xf32> to vector<8x32xf32>
    %39 = vector.shape_cast %36 : vector<8x32xf32> to vector<1x1x8x32xf32>
    tpu.vector_store %arg8[%c0_18, %c0_19, %c0_20, %c0_21], %39 {strides = array<i32>} : memref<2x1x8x32xf32, #tpu.memory_space<vmem>>, vector<1x1x8x32xf32>,
    %40 = vector.extract_strided_slice %30 {offsets = [0, 64], sizes = [8, 32], strides = [1, 1]} : vector<8x96xf32> to vector<8x32xf32>
    %c1 = arith.constant 1 : index
    %c0_22 = arith.constant 0 : index
    %c0_23 = arith.constant 0 : index
    %c0_24 = arith.constant 0 : index
    %41 = vector.load %arg8[%c1, %c0_22, %c0_23, %c0_24] : memref<2x1x8x32xf32, #tpu.memory_space<vmem>>, vector<1x1x8x32xf32>
    %42 = vector.shape_cast %41 : vector<1x1x8x32xf32> to vector<8x32xf32>
    %43 = vector.shape_cast %40 : vector<8x32xf32> to vector<1x1x8x32xf32>
    tpu.vector_store %arg8[%c1, %c0_22, %c0_23, %c0_24], %43 {strides = array<i32>} : memref<2x1x8x32xf32, #tpu.memory_space<vmem>>, vector<1x1x8x32xf32>,
    return
  }
  func.func @transform_0(%arg0: i32, %arg1: i32) -> (i32, i32, i32) {
    %c0_i32 = arith.constant 0 : i32
    %c0_i32_0 = arith.constant 0 : i32
    return %arg0, %arg1, %c0_i32 : i32, i32, i32
  }
  func.func @transform_1(%arg0: i32, %arg1: i32) -> (i32, i32) {
    %c0_i32 = arith.constant 0 : i32
    %c0_i32_0 = arith.constant 0 : i32
    %c0_i32_1 = arith.constant 0 : i32
    return %c0_i32, %c0_i32_0 : i32, i32
  }
  func.func @transform_2(%arg0: i32, %arg1: i32) -> (i32, i32) {
    %c0_i32 = arith.constant 0 : i32
    %c0_i32_0 = arith.constant 0 : i32
    %c0_i32_1 = arith.constant 0 : i32
    return %c0_i32, %c0_i32_0 : i32, i32
  }
  func.func @transform_3(%arg0: i32, %arg1: i32) -> (i32, i32) {
    %c0_i32 = arith.constant 0 : i32
    %c0_i32_0 = arith.constant 0 : i32
    %c0_i32_1 = arith.constant 0 : i32
    return %c0_i32, %c0_i32_0 : i32, i32
  }
  func.func @transform_4(%arg0: i32, %arg1: i32) -> (i32, i32) {
    %c0_i32 = arith.constant 0 : i32
    %c0_i32_0 = arith.constant 0 : i32
    %c0_i32_1 = arith.constant 0 : i32
    return %c0_i32, %c0_i32_0 : i32, i32
  }
  func.func @transform_5(%arg0: i32, %arg1: i32) -> (i32, i32, i32) {
    %c0_i32 = arith.constant 0 : i32
    %c0_i32_0 = arith.constant 0 : i32
    return %arg0, %arg1, %c0_i32 : i32, i32, i32
  }
  func.func @transform_6(%arg0: i32, %arg1: i32) -> (i32, i32, i32, i32) {
    %c0_i32 = arith.constant 0 : i32
    %c0_i32_0 = arith.constant 0 : i32
    %c0_i32_1 = arith.constant 0 : i32
    return %c0_i32, %arg0, %arg1, %c0_i32_0 : i32, i32, i32, i32
  }
}

</mosaic_0001>

<bundles_post_ra>
// kernel: tpu_custom_call.1
= control target key start
LH: loop header
LB: loop body
LE: loop exit
PB: predicated region body
PF: predicated region fallthrough
CT: control target
= control target key end

     0   :  { %s1270_s0 = inlined_call_operand.hbm [shape: f32[2,16,32], index: 0, kind: input, shape index: {}]   ;;  %s1271_s1 = inlined_call_operand.vmem [shape: f32[1,32], index: 1, kind: input, shape index: {}]   ;;  %s1272_s2 = inlined_call_operand.vmem [shape: f32[1,32], index: 2, kind: input, shape index: {}]   ;;  %s1273_s3 = inlined_call_operand.hbm [shape: bf16[32,96], index: 3, kind: input, shape index: {}]   ;;  %s1274_s4 = inlined_call_operand.vmem [shape: f32[1,96], index: 4, kind: input, shape index: {}]   ;;  %s1275_s5 = inlined_call_operand.hbm [shape: bf16[2,16,32], index: 5, kind: output, shape index: {0}]   ;;  %s1276_s6 = inlined_call_operand.hbm [shape: f32[2,2,16,32], index: 6, kind: output, shape index: {1}]  }
   0x1   :  { %1288 = sst [smem:[#allocation18_spill]] %s1273_s3 }
   0x2   :  { %1289 = sst [smem:[#allocation19_spill]] %s1275_s5 }
   0x3   :  { %1290 = sst [smem:[#allocation20_spill]] %s1276_s6 }
   0x4   :  { %12 = vsyncpa [#allocation3], 0 }
   0x5   :  { %14 = vsyncpa [#allocation3 + $0x1], 0 }
   0x6   :  { %15 = vsyncpa [#allocation6], 0 }
   0x7   :  { %16 = vsyncpa [#allocation4], 0 }
   0x8   :  { %18 = vsyncpa [#allocation4 + $0x1], 0 }
   0x9   :  { %19 = vsyncpa [#allocation9], 0 }
   0xa   :  { %21 = vsyncpa [#allocation9 + $0x1], 0  ;;  %s981_s21 = smov 0   ;;  %s983_s22 = smov 0  }
   0xb   :  { %s985_s23 = smov 0   ;;  %s987_s24 = smov 0  }
   0xc   :  { %s989_s25 = smov 0   ;;  %s991_s26 = smov 0  }
   0xd   :  { %s993_s27 = smov 0   ;;  %s995_s28 = smov 0  }
   0xe LB: > { %1291 = sst [smem:[#allocation14_spill]] %s903_s21  ;;  %s593_s29 = sadd.s32 4294967295, %s931_s28   ;;  %s931_s28 = sphi %s995_s28, %s27_s28   ;;  %s927_s27 = sphi %s993_s27, %s1322_s27   ;;  %s923_s26 = sphi %s991_s26, %s1321_s26   ;;  %s919_s25 = sphi %s989_s25, %s1320_s25   ;;  %s915_s24 = sphi %s987_s24, %s1319_s24   ;;  %s911_s23 = sphi %s985_s23, %s1318_s23   ;;  %s907_s22 = sphi %s983_s22, %s1317_s22   ;;  %s903_s21 = sphi %s981_s21, %s1316_s21  }
   0xf   : > { %s594_s30 = sadd.s32 4294967294, %s931_s28   ;;  %p61_p0 = scmp.ne.s32.totalorder %s907_s22, %s903_s21 }
  0x10   : > { %p1025_p1 = scmp.eq.s32.totalorder %s593_s29, 0  ;;  %p1029_p2 = scmp.eq.s32.totalorder %s593_s29, 3 }
  0x11   : > { %p177_p3 = scmp.eq.s32.totalorder %s594_s30, 3  ;;  %p595_p5 = scmp.ge.s32.totalorder %s931_s28, 1 }
  0x12   : > { %s1292_s7 = scalar_select %p1025_p1, 1, 0 }
  0x13   : > { %s1293_s8 = scalar_select %p1029_p2, 1, 0 }
  0x14   : > { %p1035_p4 = por %p1025_p1, %p61_p0  ;;  %p1040_p6 = por %p177_p3, %p61_p0 }
  0x15   : > { %p212_p7 = scmp.lt.s32.totalorder %s931_s28, 5  ;;  %s933_s12 = smov [#allocation5]  }
  0x16   : > { %s1294_s9 = scalar_select %p1035_p4, 1, 0 }
  0x17   : > { %s1295_s10 = scalar_select %p1040_p6, 1, 0 }
  0x18   : > { %p1045_p8 = pnand %p595_p5, %p212_p7  ;;  %s230_s13 = sshll.u32 %s933_s12, 4  ;;  %s231_s13 = int_to_ptr.vmem [resolvable:$true] %s230_s13 }
  0x19   : > { %1296 = sst [smem:[#allocation15_spill]] %s1295_s10  ;;  %s1299_s3 = sld [smem:[#allocation18_spill]] }
  0x1a   : > { %s1297_s11 = scalar_select %p1045_p8, 1, 0 }
  0x1b   : > { %p642_p9 = pneg %p1045_p8 }
  0x1d   : > { %p1053_p10 = pnand %p642_p9, %p1025_p1 }
  0x1f   : > { %s739_s17 = scalar_lea.hbm %s1299_s3, 256  ;;  %p741_p12 = pneg %p1053_p10 }
  0x20   : > { %p740_p11 = scmp.ne.s32.totalorder %s1299_s3, %s739_s17  ;;  %p746_p3 = scmp.lt.u32.totalorder %s739_s17, %s1299_s3 }
  0x22   : > { %p742_p13 = pnand %p741_p12, %p740_p11 }
  0x24   : > { %p743_p0 = pneg %p742_p13 }
  0x26   : > { %p748_p5 = pnand %p746_p3, %p743_p0 }
  0x28   : > { %751 = shalt.err (!%p748_p5)
}
  0x29   : > { %s752_s30 = scalar_lea.vmem %s231_s13, 256  ;;  %p760_p1 = scmp.lt.s32.totalorder %s231_s13, %s231_s13 }
  0x2a   : > { %p753_p7 = scmp.ne.s32.totalorder %s231_s13, %s752_s30  ;;  %p761_p4 = scmp.lt.s32.totalorder %s752_s30, %s752_s30 }
  0x2c   : > { %p755_p9 = pnand %p753_p7, %p741_p12  ;;  %p762_p8 = por %p761_p4, %p760_p1 }
  0x2e   : > { %p756_p6 = pneg %p755_p9 }
  0x30   : > { %p763_p2 = pnand %p762_p8, %p756_p6 }
  0x32   : > { %766 = shalt.err (!%p763_p2)
}
  0x33   : > { %s934_s12 = smov 64   ;;  %s935_s15 = smov 4  }
  0x34   : > { %645 = dma.hbm_to_vmem [thread:$0]  (!%p1053_p10), %s1299_s3, 256, %s231_s13, [#allocation6], %s934_s12, %s934_s12, %s935_s15  }
  0x35   : > { %s36_s18 = sadd.s32 1, %s923_s26  ;;  %s39_s19 = sadd.s32 1, %s927_s27 }
  0x36   : > { %p37_p1 = scmp.ge.s32.totalorder %s36_s18, 2  ;;  %s48_s20 = sadd.s32 1, %s911_s23 }
  0x37   : > { %p55_p2 = scmp.ne.s32.totalorder %s911_s23, %s907_s22  ;;  %p56_p4 = scmp.eq.s32.totalorder %s931_s28, 0 }
  0x38   : > { %s1324_s18 = smov (%p37_p1, %s36_s18), 0  ;;  %s1326_s19 = smov (!%p37_p1, %s39_s19), %s927_s27 }
  0x39   : > { %1300 = sst [smem:[#allocation16_spill]] %s1324_s18  ;;  %s44_s29 = ssub.s32 %s923_s26, %s1324_s18 }
  0x3a   : > { %p41_p6 = scmp.ge.s32.totalorder %s1326_s19, 2  ;;  %p1301_p8 = scmp.ne.s32.totalorder %s1293_s8, 0 }
  0x3b   : > { %p1090_p10 = por %p56_p4, %p55_p2  ;;  %p658_p12 = scmp.lt.s32.totalorder %s931_s28, 4 }
  0x3c   : > { %p1086_p11 = por %p1301_p8, %p55_p2  ;;  %s1328_s19 = smov (%p41_p6, %s1326_s19), 0 }
  0x3d   : > { %s247_s30 = sand.u32 1, %s911_s23   ;;  %s599_s12 = sshll.u32 %s927_s27, 1 }
  0x3e   : > { %s1302_s14 = scalar_select %p1086_p11, 1, 0 }
  0x3f   : > { %s43_s15 = ssub.s32 %s927_s27, %s1328_s19  ;;  %s598_s17 = sshll.u32 %s247_s30, 3 }
  0x40   : > { %1303 = sst [smem:[#allocation17_spill]] %s1302_s14  ;;  %s45_s16 = sor.u32 %s44_s29, %s43_s15 }
  0x41   : > { %p46_p13 = scmp.eq.s32.totalorder %s45_s16, 0  ;;  %s256_s8 = sadd.s32 %s923_s26, %s599_s12 }
  0x42   : > { %s251_s3 = scalar_lea.vmem [#allocation2], %s598_s17  ;;  %s600_s21 = sshll.u32 %s256_s8, 7 }
  0x43   : > { %s260_s18 = sshll.u32 %s251_s3, 4  ;;  %s1110_s14 = scalar_lea.hbm %s1270_s0, %s600_s21  ;;  %s1105_s18 = int_to_ptr.vmem [resolvable:$true] %s260_s18 }
  0x44   : > { %s1103_s10 = scalar_select %p46_p13, %s911_s23, %s48_s20  }
  0x45   : > { %p1116_p0 = pnand %p658_p12, %p1090_p10  ;;  %s248_s3 = scalar_lea.sflag [#allocation3], %s247_s30 }
  0x46   : > { %s767_s20 = scalar_lea.hbm %s1110_s14, 128  ;;  %s772_s21 = scalar_lea.hbm %s1270_s0, 512 }
  0x47   : > { %p768_p3 = scmp.ne.s32.totalorder %s1110_s14, %s767_s20  ;;  %p769_p5 = pneg %p1116_p0 }
  0x48   : > { %p773_p1 = scmp.lt.u32.totalorder %s1110_s14, %s1270_s0  ;;  %p774_p2 = scmp.lt.u32.totalorder %s772_s21, %s767_s20 }
  0x49   : > { %p770_p7 = pnand %p769_p5, %p768_p3  ;;  %p776_p6 = scmp.lt.u32.totalorder %s767_s20, %s1110_s14 }
  0x4a   : > { %p775_p4 = por %p774_p2, %p773_p1 }
  0x4b   : > { %p771_p9 = pneg %p770_p7 }
  0x4c   : > { %p777_p8 = por %p776_p6, %p775_p4 }
  0x4e   : > { %p778_p10 = pnand %p777_p8, %p771_p9 }
  0x50   : > { %781 = shalt.err (!%p778_p10)
}
  0x51   : > { %s782_s30 = scalar_lea.vmem %s1105_s18, 128  ;;  %s936_s15 = smov [#allocation2]  }
  0x52   : > { %p783_p12 = scmp.ne.s32.totalorder %s1105_s18, %s782_s30  ;;  %s787_s16 = sshll.u32 %s936_s15, 4  ;;  %s788_s16 = int_to_ptr.vmem [resolvable:$false] %s787_s16 }
  0x53   : > { %s789_s17 = scalar_lea.vmem %s788_s16, 256  ;;  %p790_p7 = scmp.lt.s32.totalorder %s1105_s18, %s788_s16 }
  0x54   : > { %p785_p13 = pnand %p783_p12, %p769_p5  ;;  %p791_p1 = scmp.lt.s32.totalorder %s789_s17, %s782_s30 }
  0x56   : > { %p786_p3 = pneg %p785_p13  ;;  %p792_p2 = por %p791_p1, %p790_p7 }
  0x58   : > { %p793_p4 = pnand %p792_p2, %p786_p3 }
  0x5a   : > { %796 = shalt.err (!%p793_p4)
}
  0x5b   : > { %649 = dma.hbm_to_vmem [thread:$0]  (!%p1116_p0), %s1110_s14, 128, %s1105_s18, %s248_s3  }
  0x5c   : > { %p1306_p9 = scmp.ne.s32.totalorder %s1297_s11, 0 }
  0x5d   : > { %s1148_s8 = sand.u32 (!%p1306_p9), 1, %s907_s22   ;;  %p1307_p5 = scmp.ne.s32.totalorder (!%p1306_p9), %s1294_s9, 0 }
  0x5e   : > { %269 = sbr.rel (%p1306_p9) target bundleno = 781 (0x30d), region = 40  ;;  %s602_s20 = sshll.u32 (!%p1306_p9), %s1148_s8, 3 }
  0x5f   : > { %s272_s5 = scalar_lea.sflag (!%p1306_p9), [#allocation3], %s1148_s8  ;;  %s275_s6 = scalar_lea.vmem (!%p1306_p9), [#allocation2], %s602_s20 }
  0x65   : > { %886 = dma.done.wait (%p1307_p5), %s272_s5, 128  }
  0x66   : > { %888 = vsyncadd (%p1307_p5), %s272_s5, 4294967168  ;;  %p1308_p6 = scmp.ne.s32.totalorder %s1292_s7, 0 }
  0x68   : > { %890 = dma.done.wait (%p1308_p6), [#allocation6], 256  }
  0x69   : > { %892 = vsyncadd (%p1308_p6), [#allocation6], 4294967040  ;;  %vm317_vm0 = vcmask 261120   ;;  %v314_v0 = vld [vmem:[%s275_s6] sm:$0xff]  ;;  %v735_v7 = vld [vmem:[#allocation5] sm:$0xff]   ;;  %v937_v8 = vmov 0.0  }
  0x6a   : > { %v318_v1 = vsel %vm317_vm0, %v314_v0, 0.0  ;;  %624 = vmatprep.subr.bf16.mxu0 %v937_v8  ;;  %vm938_vm1 = vmmov 0   ;;  %v736_v9 = vld [vmem:[#allocation5 + $0x8] sm:$0xff]   ;;  %v606_v13 = vld [vmem:[%s1271_s1] ss:$0 sm:$0xff]  ;;  %s615_s14 = sshll.u32 %s919_s25, 1 }
  0x6b   : > { %319 = vadd.xlane.f32.xlu0 %v318_v1  ;;  %628 = vmatprep.mubr.msk.bf16.mxu0 %vm938_vm1, %v937_v8  ;;  %v607_v16 = vld [vmem:[%s1272_s2] ss:$0 sm:$0xff]  ;;  %s604_s29 = sshll.u32 %s1148_s8, 2  ;;  %s1172_s3 = sadd.s32 %s915_s24, %s615_s14  ;;  %vm414_vm2 = vcmask 257024  }
  0x6c   : > { %625 = vmatpush3.bf16.msra.mxu0 %v735_v7  ;;  %v608_v20 = vld [vmem:[%s1274_s4] ss:$0 sm:$0xff]  ;;  %s616_s12 = sshll.u32 %s1172_s3, 6  ;;  %s305_s30 = scalar_lea.vmem [#allocation7], %s604_s29 }
  0x6d   : > { %626 = vmatprep.subr.bf16.mxu0 %v937_v8  ;;  %s447_s16 = sshll.u32 %s305_s30, 4  ;;  %s939_s25 = smov 96   ;;  %s1183_s16 = int_to_ptr.vmem [resolvable:$true] %s447_s16 }
  0x6e   : > { %s1310_s20 = sld [smem:[#allocation19_spill]]  ;;  %s427_s6 = scalar_lea.sflag [#allocation4], %s1148_s8 }
  0x6f   : > { %s797_s7 = scalar_lea.vmem %s1183_s16, 64  ;;  %s940_s9 = smov [#allocation7]  }
  0x70   : > { %627 = vmatpush3.bf16.msra.mxu0 %v736_v9  ;;  %p798_p0 = scmp.ne.s32.totalorder %s1183_s16, %s797_s7  ;;  %s801_s11 = sshll.u32 %s940_s9, 4  ;;  %s802_s11 = int_to_ptr.vmem [resolvable:$false] %s801_s11 }
  0x71   : > { %s803_s18 = scalar_lea.vmem %s802_s11, 128  ;;  %p804_p12 = scmp.lt.s32.totalorder %s1183_s16, %s802_s11 }
  0x72   : > { %p799_p8 = pnand %p798_p0, %p1086_p11  ;;  %p805_p13 = scmp.lt.s32.totalorder %s803_s18, %s797_s7 }
  0x74   : > { %s1181_s5 = scalar_lea.hbm %s1310_s20, %s616_s12  ;;  %p800_p10 = pneg %p799_p8 }
  0x75   : > { %p806_p3 = por %p805_p13, %p804_p12 }
  0x77   : > { %p807_p7 = pnand %p806_p3, %p800_p10 }
  0xf8   : > { %v320_v2 = vpop.xlane.xlu0 %319 }
  0xf9   : > { %v322_v3 = vmul.f32 0.03125, %v320_v2 }
  0xfb   : > { %v323_v4 = vsub.f32 %v314_v0, %v322_v3 }
  0xfd   : > { %v324_v5 = vmul.f32 %v323_v4, %v323_v4  ;;  %v335_v14 = vmul.f32 %v606_v13, %v323_v4 }
  0xff   : > { %v325_v6 = vsel %vm317_vm0, %v324_v5, 0.0 }
 0x100   : > { %326 = vadd.xlane.f32.xlu0 %v325_v6 }
 0x18d   : > { %v327_v10 = vpop.xlane.xlu0 %326 }
 0x18e   : > { %v328_v11 = vmul.f32 0.03125, %v327_v10 }
 0x190   : > { %v336_v12 = vadd.f32 1e-12, %v328_v11 }
 0x192   : > { %737 = vrcp.f32 %v336_v12 }
 0x19c   : > { %v738_v15 = vpop.eup %737 }
 0x19d   : > { %v338_v17 = vmul.f32 %v738_v15, %v335_v14 }
 0x19f   : > { %v345_v18 = vadd.f32 %v607_v16, %v338_v17 }
 0x1a1   : > { %v346_v19 = vpack.c.bf16 %v345_v18, %v345_v18 }
 0x1a3   : > { %629 = vmatmul.mubr.msk.bf16.vlgmr.msra.gmra.mrb[0].mxu0 %vm317_vm0, %v346_v19 }
 0x276   : > { %v407_v21 = vpop.f32.mrb[0].mxu0 }
 0x277   : > { %v408_v22 = vadd.f32 %v608_v20, %v407_v21  ;;  %v630_v23 = vpop.f32.mrb[1].mxu0 }
 0x278   : > { %v410_v24 = vpop.f32.mrb[2].mxu0 }
 0x279   : > { %v413_v25 = vpack.c.bf16 %v408_v22, %v408_v22  ;;  %417 = vrot.lane.b32.xlu1 %v408_v22, %s939_s25  ;;  %v631_v26 = vpop.f32.mrb[3].mxu0 }
 0x27b   : > { %415 = vst.msk [vmem:[%s305_s30] sm:$0xf] %vm414_vm2, %v413_v25 }
 0x27c   : > { %810 = shalt.err (!%p807_p7)
}
 0x27d   : > { %s811_s14 = scalar_lea.hbm %s1181_s5, 64  ;;  %s815_s13 = scalar_lea.hbm %s1310_s20, 256 }
 0x27e   : > { %p812_p1 = scmp.ne.s32.totalorder %s1181_s5, %s811_s14  ;;  %p816_p9 = scmp.lt.u32.totalorder %s1181_s5, %s1310_s20 }
 0x27f   : > { %p817_p5 = scmp.lt.u32.totalorder %s815_s13, %s811_s14  ;;  %p819_p0 = scmp.lt.u32.totalorder %s811_s14, %s1181_s5 }
 0x280   : > { %p813_p2 = pnand %p812_p1, %p1086_p11 }
 0x281   : > { %p818_p6 = por %p817_p5, %p816_p9 }
 0x282   : > { %p814_p4 = pneg %p813_p2 }
 0x283   : > { %p820_p8 = por %p819_p0, %p818_p6 }
 0x285   : > { %p821_p10 = pnand %p820_p8, %p814_p4 }
 0x287   : > { %824 = shalt.err (!%p821_p10)
}
 0x288   : > { %638 = dma.vmem_to_hbm [thread:$0]  (%p1086_p11), %s1183_s16, 64, %s1181_s5, %s427_s6  }
 0x289   : > { %s941_s25 = smov 64   ;;  %s605_s24 = sshll.u32 %s1148_s8, 4 }
 0x28a   : > { %421 = vrot.lane.b32.xlu1 %v408_v22, %s941_s25  ;;  %s312_s17 = scalar_lea.vmem [#allocation8], %s605_s24  ;;  %s618_s9 = sshll.u32 %s1172_s3, 7 }
 0x28b   : > { %s461_s7 = sshll.u32 %s312_s17, 4  ;;  %s1311_s14 = sld [smem:[#allocation20_spill]]  ;;  %s1209_s7 = int_to_ptr.vmem [resolvable:$true] %s461_s7 }
 0x28c   : > { %s432_s16 = scalar_lea.sflag [#allocation9], %s1148_s8  ;;  %s825_s5 = scalar_lea.vmem %s1209_s7, 256 }
 0x28d   : > { %p826_p12 = scmp.ne.s32.totalorder %s1209_s7, %s825_s5  ;;  %s942_s3 = smov [#allocation8]  }
 0x28e   : > { %s829_s6 = sshll.u32 %s942_s3, 4  ;;  %s830_s6 = int_to_ptr.vmem [resolvable:$false] %s829_s6 }
 0x28f   : > { %p827_p13 = pnand %p826_p12, %p1086_p11  ;;  %s831_s21 = scalar_lea.vmem %s830_s6, 512 }
 0x290   : > { %p832_p7 = scmp.lt.s32.totalorder %s1209_s7, %s830_s6  ;;  %p833_p1 = scmp.lt.s32.totalorder %s831_s21, %s825_s5 }
 0x291   : > { %s1215_s29 = scalar_lea.hbm %s1311_s14, %s618_s9  ;;  %p828_p3 = pneg %p827_p13 }
 0x292   : > { %p834_p2 = por %p833_p1, %p832_p7 }
 0x294   : > { %p835_p4 = pnand %p834_p2, %p828_p3 }
 0x2eb   : > { %v418_v27 = vpop.permute.xlu1 %417 }
 0x2ec   : > { %420 = vst.msk [vmem:[%s312_s17] sm:$0xff] %vm317_vm0, %v418_v27 }
 0x2fc   : > { %v422_v28 = vpop.permute.xlu1 %421 }
 0x2fd   : > { %612 = vst.msk [vmem:[%s312_s17 + $0x8] sm:$0xff] %vm317_vm0, %v422_v28 }
 0x2fe   : > { %838 = shalt.err (!%p835_p4)
}
 0x2ff   : > { %s839_s13 = scalar_lea.hbm %s1215_s29, 256  ;;  %s843_s25 = scalar_lea.hbm %s1311_s14, 1024 }
 0x300   : > { %p840_p9 = scmp.ne.s32.totalorder %s1215_s29, %s839_s13  ;;  %p844_p0 = scmp.lt.u32.totalorder %s1215_s29, %s1311_s14 }
 0x301   : > { %p845_p8 = scmp.lt.u32.totalorder %s843_s25, %s839_s13  ;;  %p847_p12 = scmp.lt.u32.totalorder %s839_s13, %s1215_s29 }
 0x302   : > { %p841_p5 = pnand %p840_p9, %p1086_p11 }
 0x303   : > { %p846_p10 = por %p845_p8, %p844_p0 }
 0x304   : > { %p842_p6 = pneg %p841_p5 }
 0x305   : > { %p848_p13 = por %p847_p12, %p846_p10 }
 0x307   : > { %p849_p3 = pnand %p848_p13, %p842_p6 }
 0x309   : > { %852 = shalt.err (!%p849_p3)
}
 0x30a   : > { %s943_s9 = smov 128   ;;  %s944_s11 = smov 512  }
 0x30b   : > { %s945_s18 = smov 8  }
 0x30c   : > { %639 = dma.vmem_to_hbm [thread:$0]  (%p1086_p11), %s1209_s7, 256, %s1215_s29, %s432_s16, %s943_s9, %s944_s11, %s945_s18  }
 0x30d PF: > { %s1312_s5 = sld [smem:[#allocation14_spill]]  ;;  %s1313_s3 = sld [smem:[#allocation15_spill]] }
 0x30e   : > { %p660_p7 = scmp.ge.s32.totalorder %s931_s28, 2 }
 0x313   : > { %s476_s6 = sand.u32 1, %s1312_s5   ;;  %p1314_p1 = scmp.ne.s32.totalorder %s1313_s3, 0 }
 0x314   : > { %s477_s21 = scalar_lea.sflag [#allocation4], %s476_s6 }
 0x315   : > { %p651_p2 = pnand %p660_p7, %p1314_p1 }
 0x317   : > { %894 = dma.done.wait (!%p651_p2), %s477_s21, 64  }
 0x318   : > { %896 = vsyncadd (!%p651_p2), %s477_s21, 4294967232  ;;  %s486_s13 = scalar_lea.sflag [#allocation9], %s476_s6 }
 0x319   : > { %898 = dma.done.wait (!%p651_p2), %s486_s13, 256  }
 0x31a   : > { %900 = vsyncadd (!%p651_p2), %s486_s13, 4294967040  ;;  %s27_s28 = sadd.s32 1, %s931_s28   ;;  %s1315_s8 = sld [smem:[#allocation16_spill]] }
 0x31b   : > { %p24_p4 = scmp.ge.s32.totalorder %s27_s28, 6   ;;  %s1316_s21 = smov %s907_s22 }
 0x31c   : > { %s1317_s22 = smov %s911_s23  ;;  %s1318_s23 = smov %s1103_s10 }
 0x31d   : > { %s1319_s24 = smov %s923_s26  ;;  %s1320_s25 = smov %s927_s27 }
 0x31e   : > { %s1322_s27 = smov %s1328_s19  ;;  %26 = sbr.rel (!%p24_p4) target bundleno = 14 (0xe), region = 107 }
 0x320   : > { %s1321_s26 = smov %s1315_s8 }
 0x325   :  { %491 = vsyncpa [#allocation3], 1 }
 0x326   :  { %493 = vsyncpa [#allocation3 + $0x1], 1 }
 0x327   :  { %494 = vsyncpa [#allocation6], 1 }
 0x328   :  { %495 = vsyncpa [#allocation4], 1 }
 0x329   :  { %497 = vsyncpa [#allocation4 + $0x1], 1 }
 0x32a   :  { %498 = vsyncpa [#allocation9], 1 }
 0x32b   :  { %500 = vsyncpa [#allocation9 + $0x1], 1 }

</bundles_post_ra>
